<compile_context>
chip_gen: v6e
topology: v6e:2x2x1
jax: 0.10.0
libtpu: 0.0.40
codegen_flags: <defaults>
</compile_context>

<pallas_src>
import functools

import jax
import jax.numpy as jnp
from jax.experimental import pallas as pl
from jax.experimental.pallas import tpu as pltpu

M = 100
EMBEDDING_DIM = 16
NUM_USERS = 10000
BATCH = 32

LANE = 128


def _round_up(x, m):
    return ((x + m - 1) // m) * m


def _qr_kernel(uid_ref, tab_ref, bias_ref, o_ref, *, m, nq_pad):
    """uid_ref : (1, BP) int32   raw user ids (padded lanes hold 0, discarded later)
       tab_ref : (D, NTOT) f32   [ w-folded quotient table^T | remainder table^T ]
       bias_ref: (1, 1)   f32    SMEM scalar
       o_ref   : (1, BP)  f32    lane-dense output
    """
    ntot = tab_ref.shape[1]
    bp = uid_ref.shape[1]

    uid = uid_ref[...]                                                  # (1, BP) int32

    # quotient / remainder on the VPU (exact for ids < 10000 in f32).
    qi = jnp.floor(uid.astype(jnp.float32) / jnp.float32(m)).astype(jnp.int32)   # (1, BP)
    ri = uid - qi * m                                                             # (1, BP)

    # Block-diagonal one-hot: columns [0, BP) select quotient rows, columns
    # [BP, 2BP) select remainder rows (offset by nq_pad into the packed table).
    target = jnp.concatenate([qi, nq_pad + ri], axis=1)                 # (1, 2*BP)
    onehot = (jax.lax.broadcasted_iota(jnp.int32, (ntot, 2 * bp), 0)
              == target).astype(jnp.float32)                           # (NTOT, 2*BP)

    # Single fused MXU gather: [emb_q' | emb_r] side by side on lanes.
    emb = jnp.dot(tab_ref[...], onehot, preferred_element_type=jnp.float32)  # (D, 2*BP)
    emb_q = emb[:, :bp]                                                 # (D, BP)  (fc_w folded in)
    emb_r = emb[:, bp:]                                                 # (D, BP)

    # Head: sublane reduce (XLU) + SMEM bias scalar; lane-dense (1, BP) store.
    out = jnp.sum(emb_q * emb_r, axis=0, keepdims=True) + bias_ref[0, 0]
    o_ref[...] = out.astype(o_ref.dtype)


def init_packed_params(q_table, r_table, fc_w, fc_b):
    """One-time parameter prep (do NOT call per forward pass).

    Returns (packed_table (D, nq_pad+nr_pad) f32, bias (1,1) f32, nq_pad).
    fc_w is folded into the quotient half; padded columns are zero and never
    selected (quotient idx <= 99 < 101, remainder idx <= 99 < 100).
    """
    nq, d = q_table.shape
    nr = r_table.shape[0]
    nq_pad = _round_up(nq, LANE)
    nr_pad = _round_up(nr, LANE)

    w = fc_w.reshape(d).astype(jnp.float32)
    packed = jnp.zeros((d, nq_pad + nr_pad), jnp.float32)
    packed = packed.at[:, :nq].set(q_table.T.astype(jnp.float32) * w[:, None])
    packed = packed.at[:, nq_pad:nq_pad + nr].set(r_table.T.astype(jnp.float32))

    bias = fc_b.reshape(1, 1).astype(jnp.float32)
    return packed, bias, nq_pad


def recommendation_forward(user_ids, packed_table, bias, nq_pad, m=M):
    """user_ids: int [B]; returns float32 [B, 1] (same semantics as the torch model)."""
    b = user_ids.shape[0]
    bp = _round_up(b, LANE)
    d, ntot = packed_table.shape

    # Lane-pad the batch to 128 (padded lanes compute garbage, sliced off below).
    uid = jnp.zeros((1, bp), jnp.int32).at[0, :b].set(user_ids.astype(jnp.int32))

    kernel = functools.partial(_qr_kernel, m=m, nq_pad=nq_pad)

    vmem = pl.BlockSpec(memory_space=pltpu.MemorySpace.VMEM)
    smem = pl.BlockSpec(memory_space=pltpu.MemorySpace.SMEM)

    cost = pl.CostEstimate(
        flops=2 * d * ntot * (2 * bp),
        transcendentals=0,
        bytes_accessed=packed_table.size * 4 + bp * 4 + 4 + bp * 4,
    )

    out_1bp = pl.pallas_call(
        kernel,
        out_shape=jax.ShapeDtypeStruct((1, bp), jnp.float32),
        in_specs=[vmem, vmem, smem],
        out_specs=vmem,
        cost_estimate=cost,
    )(uid, packed_table, bias)

    return out_1bp[0, :b].reshape(b, 1)


def _reference(user_ids, q_table, r_table, fc_w, fc_b, m=M):
    q = user_ids // m
    r = user_ids % m
    emb = q_table[q] * r_table[r]
    return emb @ fc_w.T + fc_b  # (B, 1)


if __name__ == "__main__":
    key = jax.random.PRNGKey(0)
    k_ids, k_q, k_r, k_w, k_b = jax.random.split(key, 5)

    user_ids = jax.random.randint(k_ids, (BATCH,), 0, NUM_USERS, dtype=jnp.int32)

    # Deterministic parameter init (shapes from the module's __init__)
    q_table = jax.random.normal(k_q, (NUM_USERS // M + 1, EMBEDDING_DIM), jnp.float32) * 0.1
    r_table = jax.random.normal(k_r, (M, EMBEDDING_DIM), jnp.float32) * 0.1
    fc_w = jax.random.normal(k_w, (1, EMBEDDING_DIM), jnp.float32) * 0.1
    fc_b = jax.random.normal(k_b, (1,), jnp.float32) * 0.1

    # One-time prep (hoisted out of the per-call path).
    packed_table, bias, nq_pad = init_packed_params(q_table, r_table, fc_w, fc_b)
    packed_table = jax.block_until_ready(packed_table)

    out = recommendation_forward(user_ids, packed_table, bias, nq_pad)
    out = jax.block_until_ready(out)

    ref = _reference(user_ids, q_table, r_table, fc_w, fc_b)
    assert out.shape == (BATCH, 1)
    assert jnp.allclose(out, ref, atol=1e-5, rtol=1e-5)

    print("KERNEL_OK")
</pallas_src>

<mosaic_0001>
module attributes {stable_mosaic.version = 11 : i64} {
  func.func @_qr_kernel(%arg0: memref<1x128xi32, #tpu.memory_space<vmem>>, %arg1: memref<16x256xf32, #tpu.memory_space<vmem>>, %arg2: memref<1x1xf32, #tpu.memory_space<smem>>, %arg3: memref<1x128xf32, #tpu.memory_space<vmem>>) attributes {dimension_semantics = [], scalar_prefetch = 0 : i64, scratch_operands = 0 : i64, tpu.core_type = #tpu.core_type<tc>} {
    %c0 = arith.constant 0 : index
    %c0_0 = arith.constant 0 : index
    %0 = vector.load %arg0[%c0, %c0_0] : memref<1x128xi32, #tpu.memory_space<vmem>>, vector<1x128xi32>
    %1 = arith.sitofp %0 : vector<1x128xi32> to vector<1x128xf32>
    %cst = arith.constant 1.000000e+02 : f32
    %2 = vector.broadcast %cst : f32 to vector<1x128xf32>
    %3 = arith.divf %1, %2 : vector<1x128xf32>
    %4 = math.floor %3 : vector<1x128xf32>
    %5 = arith.fptosi %4 : vector<1x128xf32> to vector<1x128xi32>
    %c100_i32 = arith.constant 100 : i32
    %6 = vector.broadcast %c100_i32 : i32 to vector<1x128xi32>
    %7 = arith.muli %5, %6 : vector<1x128xi32>
    %8 = arith.subi %0, %7 : vector<1x128xi32>
    %c128_i32 = arith.constant 128 : i32
    %9 = vector.broadcast %c128_i32 : i32 to vector<1x128xi32>
    %10 = arith.addi %9, %8 : vector<1x128xi32>
    %11 = tpu.concatenate %5, %10 in 1 : vector<1x128xi32>, vector<1x128xi32> -> vector<1x256xi32>
    %12 = tpu.iota {dimensions = array<i32: 0>} : vector<256x256xi32>
    %13 = vector.broadcast %11 : vector<1x256xi32> to vector<256x256xi32>
    %14 = arith.cmpi eq, %12, %13 : vector<256x256xi32>
    %15 = arith.extui %14 : vector<256x256xi1> to vector<256x256xi32>
    %16 = arith.sitofp %15 : vector<256x256xi32> to vector<256x256xf32>
    %c0_1 = arith.constant 0 : index
    %c0_2 = arith.constant 0 : index
    %17 = vector.load %arg1[%c0_1, %c0_2] : memref<16x256xf32, #tpu.memory_space<vmem>>, vector<16x256xf32>
    %cst_3 = arith.constant dense<0.000000e+00> : vector<16x256xf32>
    %18 = tpu.matmul %17, %16, %cst_3 {dimension_numbers = #tpu.dot_dimension_numbers<[1], [0], [0], [1], [0, 0, 1, 1], [], []>} : vector<16x256xf32>, vector<256x256xf32>, vector<16x256xf32> -> vector<16x256xf32>
    %19 = vector.extract_strided_slice %18 {offsets = [0, 0], sizes = [16, 128], strides = [1, 1]} : vector<16x256xf32> to vector<16x128xf32>
    %20 = vector.extract_strided_slice %18 {offsets = [0, 128], sizes = [16, 128], strides = [1, 1]} : vector<16x256xf32> to vector<16x128xf32>
    %21 = arith.mulf %19, %20 : vector<16x128xf32>
    %cst_4 = arith.constant dense<0.000000e+00> : vector<128xf32>
    %22 = vector.multi_reduction <add>, %21, %cst_4 [0] : vector<16x128xf32> to vector<128xf32>
    %23 = vector.shape_cast %22 : vector<128xf32> to vector<1x128xf32>
    %c0_5 = arith.constant 0 : index
    %c0_6 = arith.constant 0 : index
    %24 = memref.load %arg2[%c0_5, %c0_6] : memref<1x1xf32, #tpu.memory_space<smem>>
    %25 = vector.broadcast %24 : f32 to vector<1x128xf32>
    %26 = arith.addf %23, %25 : vector<1x128xf32>
    %c0_7 = arith.constant 0 : index
    %c0_8 = arith.constant 0 : index
    %27 = vector.load %arg3[%c0_7, %c0_8] : memref<1x128xf32, #tpu.memory_space<vmem>>, vector<1x128xf32>
    tpu.vector_store %arg3[%c0_7, %c0_8], %26 {strides = array<i32>} : memref<1x128xf32, #tpu.memory_space<vmem>>, vector<1x128xf32>,
    return
  }
}

</mosaic_0001>

<bundles_post_ra>
// kernel: tpu_custom_call.1
= control target key start
LH: loop header
LB: loop body
LE: loop exit
PB: predicated region body
PF: predicated region fallthrough
CT: control target
= control target key end

     0   :  { %9 = vsyncpa [#allocation4], 0  ;;  %s893_s0 = inlined_call_operand.vmem [shape: s32[1,128], index: 0, kind: input, shape index: {}]   ;;  %s894_s1 = inlined_call_operand.hbm [shape: f32[16,256], index: 1, kind: input, shape index: {}]   ;;  %s895_s2 = inlined_call_operand.<no memory space> [shape: f32[1,1], index: 2, kind: input, shape index: {}]   ;;  %s896_s3 = inlined_call_operand.hbm [shape: f32[1,128], index: 3, kind: output, shape index: {}]  }
   0x1   :  { %10 = vsyncpa [#allocation5], 0  ;;  %s624_s12 = smov [#allocation3]  }
   0x2   :  { %s18_s13 = sshll.u32 %s624_s12, 4  ;;  %s19_s13 = int_to_ptr.vmem [resolvable:$true] %s18_s13 }
   0x3   :  { %s588_s14 = scalar_lea.vmem %s19_s13, 512  ;;  %p593_p1 = scmp.lt.s32.totalorder %s19_s13, %s19_s13 }
   0x4   :  { %p589_p0 = scmp.ne.s32.totalorder %s19_s13, %s588_s14  ;;  %p594_p2 = scmp.lt.s32.totalorder %s588_s14, %s588_s14 }
   0x6   :  { %p595_p3 = por %p594_p2, %p593_p1 }
   0x8   :  { %p596_p4 = pnand %p595_p3, %p589_p0 }
   0xa   :  { %599 = shalt.err (!%p596_p4)
}
   0xb   :  { %s625_s15 = smov 256   ;;  %s626_s16 = smov 16  }
   0xc   :  { %24 = dma.hbm_to_vmem [thread:$0]  %s894_s1, 512, %s19_s13, [#allocation4], %s625_s15, %s625_s15, %s626_s16  }
   0xd   :  { %620 = dma.done.wait [#allocation4], 512  }
   0xe   :  { %621 = vsyncadd [#allocation4], 4294966784  ;;  %v30_v0 = vld [vmem:[%s893_s0] sm:$0x1]  ;;  %v273_v2 = vld [vmem:[#allocation3 + $0x8] sm:$0xff]  ;;  %v39_v4 = vlaneseq  ;;  %v627_v20 = vmov 1.0   ;;  %v363_v62 = vstv %s895_s2 }
   0xf   :  { %v31_v1 = vcvt.s32.f32 %v30_v0  ;;  %v275_v3 = vld [vmem:[#allocation3 + $0x18] sm:$0xff]  ;;  %340 = vmatprep.mubr.f32.mxu0 %v273_v2  ;;  %v272_v48 = vld [vmem:[#allocation3] sm:$0xff]  ;;  %v274_v49 = vld [vmem:[#allocation3 + $0x10] sm:$0xff]  ;;  %s628_s21 = smov [#allocation6]  }
  0x10   :  { %346 = vmatprep.mubr.f32.mxu1 %v275_v3  ;;  %v655_v7 = vshrl.u32 %v39_v4, 7  ;;  %s372_s22 = sshll.u32 %s628_s21, 4  ;;  %s373_s22 = int_to_ptr.vmem [resolvable:$true] %s372_s22 }
  0x11   :  { %v33_v5 = vmul.f32 0.01, %v31_v1  ;;  %s600_s23 = scalar_lea.vmem %s373_s22, 16  ;;  %s604_s24 = scalar_lea.vmem %s373_s22, 32 }
  0x12   :  { %v74_v10 = vsub.s32 0, %v655_v7  ;;  %v55_v14 = vadd.s32 120, %v655_v7  ;;  %v54_v16 = vadd.s32 112, %v655_v7  ;;  %v53_v18 = vadd.s32 104, %v655_v7  ;;  %p601_p5 = scmp.ne.s32.totalorder %s373_s22, %s600_s23  ;;  %p605_p6 = scmp.lt.s32.totalorder %s373_s22, %s373_s22 }
  0x13   :  { %v34_v6 = vfloor.f32 %v33_v5  ;;  %v52_v19 = vadd.s32 96, %v655_v7  ;;  %v51_v21 = vadd.s32 88, %v655_v7  ;;  %v50_v22 = vadd.s32 80, %v655_v7  ;;  %p606_p7 = scmp.lt.s32.totalorder %s604_s24, %s600_s23 }
  0x14   :  { %v49_v23 = vadd.s32 72, %v655_v7  ;;  %v48_v24 = vadd.s32 64, %v655_v7  ;;  %v47_v25 = vadd.s32 56, %v655_v7  ;;  %v46_v26 = vadd.s32 48, %v655_v7 }
  0x15   :  { %v573_v8 = vtrunc.f32 %v34_v6  ;;  %v45_v27 = vadd.s32 40, %v655_v7  ;;  %v44_v28 = vadd.s32 32, %v655_v7  ;;  %v43_v29 = vadd.s32 24, %v655_v7  ;;  %p607_p8 = por %p606_p7, %p605_p6 }
  0x16   :  { %v42_v30 = vadd.s32 16, %v655_v7  ;;  %v41_v31 = vadd.s32 8, %v655_v7  ;;  %v71_v32 = vadd.s32 248, %v655_v7  ;;  %v70_v33 = vadd.s32 240, %v655_v7 }
  0x17   :  { %v574_v9 = vcvt.f32.s32 %v573_v8  ;;  %v69_v34 = vadd.s32 232, %v655_v7  ;;  %v68_v35 = vadd.s32 224, %v655_v7  ;;  %v67_v36 = vadd.s32 216, %v655_v7  ;;  %p608_p9 = pnand %p607_p8, %p601_p5 }
  0x18   :  { %v66_v37 = vadd.s32 208, %v655_v7  ;;  %v65_v38 = vadd.s32 200, %v655_v7  ;;  %v64_v39 = vadd.s32 192, %v655_v7  ;;  %v63_v40 = vadd.s32 184, %v655_v7 }
  0x19   :  { %v36_v11 = vmul.u32 100, %v574_v9  ;;  %v658_v13 = vrot.slane %v574_v9, %v74_v10  ;;  %v62_v41 = vadd.s32 176, %v655_v7  ;;  %v61_v42 = vadd.s32 168, %v655_v7 }
  0x1a   :  { %v60_v43 = vadd.s32 160, %v655_v7  ;;  %v59_v44 = vadd.s32 152, %v655_v7  ;;  %v58_v45 = vadd.s32 144, %v655_v7  ;;  %v57_v46 = vadd.s32 136, %v655_v7 }
  0x1b   :  { %v37_v12 = vsub.s32 %v30_v0, %v36_v11  ;;  %vm110_vm0 = vcmp.eq.s32.totalorder %v55_v14, %v658_v13  ;;  %vm108_vm3 = vcmp.eq.s32.totalorder %v54_v16, %v658_v13  ;;  %vm106_vm5 = vcmp.eq.s32.totalorder %v53_v18, %v658_v13 }
  0x1c   :  { %vm104_vm7 = vcmp.eq.s32.totalorder %v52_v19, %v658_v13  ;;  %vm102_vm9 = vcmp.eq.s32.totalorder %v51_v21, %v658_v13  ;;  %vm100_vm11 = vcmp.eq.s32.totalorder %v50_v22, %v658_v13  ;;  %vm98_vm13 = vcmp.eq.s32.totalorder %v49_v23, %v658_v13 }
  0x1d   :  { %v38_v15 = vadd.s32 128, %v37_v12  ;;  %vm96_vm15 = vcmp.eq.s32.totalorder %v48_v24, %v658_v13  ;;  %v56_v47 = vadd.s32 128, %v655_v7 }
  0x1f   :  { %v662_v17 = vrot.slane %v38_v15, %v74_v10 }
  0x21   :  { %vm111_vm1 = vcmp.eq.s32.totalorder %v55_v14, %v662_v17  ;;  %vm109_vm2 = vcmp.eq.s32.totalorder %v54_v16, %v662_v17  ;;  %vm107_vm4 = vcmp.eq.s32.totalorder %v53_v18, %v662_v17  ;;  %vm105_vm6 = vcmp.eq.s32.totalorder %v52_v19, %v662_v17 }
  0x22   :  { %445 = vmatprep.subr.msk.mxu0 %vm111_vm1, %v627_v20  ;;  %509 = vmatprep.subr.msk.mxu1 %vm111_vm1, %v627_v20  ;;  %vm103_vm8 = vcmp.eq.s32.totalorder %v51_v21, %v662_v17  ;;  %vm101_vm10 = vcmp.eq.s32.totalorder %v50_v22, %v662_v17  ;;  %vm99_vm12 = vcmp.eq.s32.totalorder %v49_v23, %v662_v17 }
  0x23   :  { %446 = vmatpush1.msk.msra.mxu0 %vm110_vm0, %v627_v20  ;;  %541 = vmatpush1.msk.msra.mxu1 %vm110_vm0, %v627_v20  ;;  %vm97_vm14 = vcmp.eq.s32.totalorder %v48_v24, %v662_v17  ;;  %vm95_vm0 = vcmp.eq.s32.totalorder %v47_v25, %v662_v17  ;;  %vm94_vm1 = vcmp.eq.s32.totalorder %v47_v25, %v658_v13 }
  0x24   :  { %447 = vmatprep.subr.msk.mxu0 %vm109_vm2, %v627_v20  ;;  %510 = vmatprep.subr.msk.mxu1 %vm109_vm2, %v627_v20  ;;  %vm93_vm2 = vcmp.eq.s32.totalorder %v46_v26, %v662_v17 }
  0x25   :  { %448 = vmatpush1.msk.msra.mxu0 %vm108_vm3, %v627_v20  ;;  %542 = vmatpush1.msk.msra.mxu1 %vm108_vm3, %v627_v20  ;;  %vm92_vm3 = vcmp.eq.s32.totalorder %v46_v26, %v658_v13 }
  0x26   :  { %449 = vmatprep.subr.msk.mxu0 %vm107_vm4, %v627_v20  ;;  %511 = vmatprep.subr.msk.mxu1 %vm107_vm4, %v627_v20  ;;  %vm91_vm4 = vcmp.eq.s32.totalorder %v45_v27, %v662_v17 }
  0x27   :  { %450 = vmatpush1.msk.msra.mxu0 %vm106_vm5, %v627_v20  ;;  %543 = vmatpush1.msk.msra.mxu1 %vm106_vm5, %v627_v20  ;;  %vm90_vm5 = vcmp.eq.s32.totalorder %v45_v27, %v658_v13 }
  0x28   :  { %451 = vmatprep.subr.msk.mxu0 %vm105_vm6, %v627_v20  ;;  %512 = vmatprep.subr.msk.mxu1 %vm105_vm6, %v627_v20  ;;  %vm89_vm6 = vcmp.eq.s32.totalorder %v44_v28, %v662_v17 }
  0x29   :  { %452 = vmatpush1.msk.msra.mxu0 %vm104_vm7, %v627_v20  ;;  %544 = vmatpush1.msk.msra.mxu1 %vm104_vm7, %v627_v20  ;;  %vm88_vm7 = vcmp.eq.s32.totalorder %v44_v28, %v658_v13 }
  0x2a   :  { %453 = vmatprep.subr.msk.mxu0 %vm103_vm8, %v627_v20  ;;  %513 = vmatprep.subr.msk.mxu1 %vm103_vm8, %v627_v20  ;;  %vm87_vm8 = vcmp.eq.s32.totalorder %v43_v29, %v662_v17 }
  0x2b   :  { %454 = vmatpush1.msk.msra.mxu0 %vm102_vm9, %v627_v20  ;;  %545 = vmatpush1.msk.msra.mxu1 %vm102_vm9, %v627_v20  ;;  %vm86_vm9 = vcmp.eq.s32.totalorder %v43_v29, %v658_v13 }
  0x2c   :  { %455 = vmatprep.subr.msk.mxu0 %vm101_vm10, %v627_v20  ;;  %514 = vmatprep.subr.msk.mxu1 %vm101_vm10, %v627_v20  ;;  %vm85_vm10 = vcmp.eq.s32.totalorder %v42_v30, %v662_v17 }
  0x2d   :  { %456 = vmatpush1.msk.msra.mxu0 %vm100_vm11, %v627_v20  ;;  %546 = vmatpush1.msk.msra.mxu1 %vm100_vm11, %v627_v20  ;;  %vm84_vm11 = vcmp.eq.s32.totalorder %v42_v30, %v658_v13 }
  0x2e   :  { %457 = vmatprep.subr.msk.mxu0 %vm99_vm12, %v627_v20  ;;  %515 = vmatprep.subr.msk.mxu1 %vm99_vm12, %v627_v20  ;;  %vm83_vm12 = vcmp.eq.s32.totalorder %v41_v31, %v662_v17 }
  0x2f   :  { %458 = vmatpush1.msk.msra.mxu0 %vm98_vm13, %v627_v20  ;;  %547 = vmatpush1.msk.msra.mxu1 %vm98_vm13, %v627_v20  ;;  %vm82_vm13 = vcmp.eq.s32.totalorder %v41_v31, %v658_v13 }
  0x30   :  { %459 = vmatprep.subr.msk.mxu0 %vm97_vm14, %v627_v20  ;;  %516 = vmatprep.subr.msk.mxu1 %vm97_vm14, %v627_v20  ;;  %vm81_vm14 = vcmp.eq.s32.totalorder %v655_v7, %v662_v17 }
  0x31   :  { %460 = vmatpush1.msk.msra.mxu0 %vm96_vm15, %v627_v20  ;;  %548 = vmatpush1.msk.msra.mxu1 %vm96_vm15, %v627_v20  ;;  %vm80_vm15 = vcmp.eq.s32.totalorder %v655_v7, %v658_v13 }
  0x32   :  { %461 = vmatprep.subr.msk.mxu0 %vm95_vm0, %v627_v20  ;;  %517 = vmatprep.subr.msk.mxu1 %vm95_vm0, %v627_v20  ;;  %vm143_vm0 = vcmp.eq.s32.totalorder %v71_v32, %v662_v17 }
  0x33   :  { %462 = vmatpush1.msk.msra.mxu0 %vm94_vm1, %v627_v20  ;;  %549 = vmatpush1.msk.msra.mxu1 %vm94_vm1, %v627_v20  ;;  %vm142_vm1 = vcmp.eq.s32.totalorder %v71_v32, %v658_v13 }
  0x34   :  { %463 = vmatprep.subr.msk.mxu0 %vm93_vm2, %v627_v20  ;;  %518 = vmatprep.subr.msk.mxu1 %vm93_vm2, %v627_v20  ;;  %vm141_vm2 = vcmp.eq.s32.totalorder %v70_v33, %v662_v17 }
  0x35   :  { %464 = vmatpush1.msk.msra.mxu0 %vm92_vm3, %v627_v20  ;;  %550 = vmatpush1.msk.msra.mxu1 %vm92_vm3, %v627_v20  ;;  %vm140_vm3 = vcmp.eq.s32.totalorder %v70_v33, %v658_v13 }
  0x36   :  { %465 = vmatprep.subr.msk.mxu0 %vm91_vm4, %v627_v20  ;;  %519 = vmatprep.subr.msk.mxu1 %vm91_vm4, %v627_v20  ;;  %vm139_vm4 = vcmp.eq.s32.totalorder %v69_v34, %v662_v17 }
  0x37   :  { %466 = vmatpush1.msk.msra.mxu0 %vm90_vm5, %v627_v20  ;;  %551 = vmatpush1.msk.msra.mxu1 %vm90_vm5, %v627_v20  ;;  %vm138_vm5 = vcmp.eq.s32.totalorder %v69_v34, %v658_v13 }
  0x38   :  { %467 = vmatprep.subr.msk.mxu0 %vm89_vm6, %v627_v20  ;;  %520 = vmatprep.subr.msk.mxu1 %vm89_vm6, %v627_v20  ;;  %vm137_vm6 = vcmp.eq.s32.totalorder %v68_v35, %v662_v17 }
  0x39   :  { %468 = vmatpush1.msk.msra.mxu0 %vm88_vm7, %v627_v20  ;;  %552 = vmatpush1.msk.msra.mxu1 %vm88_vm7, %v627_v20  ;;  %vm136_vm7 = vcmp.eq.s32.totalorder %v68_v35, %v658_v13 }
  0x3a   :  { %469 = vmatprep.subr.msk.mxu0 %vm87_vm8, %v627_v20  ;;  %521 = vmatprep.subr.msk.mxu1 %vm87_vm8, %v627_v20  ;;  %vm135_vm8 = vcmp.eq.s32.totalorder %v67_v36, %v662_v17 }
  0x3b   :  { %470 = vmatpush1.msk.msra.mxu0 %vm86_vm9, %v627_v20  ;;  %553 = vmatpush1.msk.msra.mxu1 %vm86_vm9, %v627_v20  ;;  %vm134_vm9 = vcmp.eq.s32.totalorder %v67_v36, %v658_v13 }
  0x3c   :  { %471 = vmatprep.subr.msk.mxu0 %vm85_vm10, %v627_v20  ;;  %522 = vmatprep.subr.msk.mxu1 %vm85_vm10, %v627_v20  ;;  %vm133_vm10 = vcmp.eq.s32.totalorder %v66_v37, %v662_v17 }
  0x3d   :  { %472 = vmatpush1.msk.msra.mxu0 %vm84_vm11, %v627_v20  ;;  %554 = vmatpush1.msk.msra.mxu1 %vm84_vm11, %v627_v20  ;;  %vm132_vm11 = vcmp.eq.s32.totalorder %v66_v37, %v658_v13 }
  0x3e   :  { %473 = vmatprep.subr.msk.mxu0 %vm83_vm12, %v627_v20  ;;  %523 = vmatprep.subr.msk.mxu1 %vm83_vm12, %v627_v20  ;;  %vm131_vm12 = vcmp.eq.s32.totalorder %v65_v38, %v662_v17 }
  0x3f   :  { %474 = vmatpush1.msk.msra.mxu0 %vm82_vm13, %v627_v20  ;;  %555 = vmatpush1.msk.msra.mxu1 %vm82_vm13, %v627_v20  ;;  %vm130_vm13 = vcmp.eq.s32.totalorder %v65_v38, %v658_v13 }
  0x40   :  { %475 = vmatprep.subr.msk.mxu0 %vm81_vm14, %v627_v20  ;;  %524 = vmatprep.subr.msk.mxu1 %vm81_vm14, %v627_v20  ;;  %vm129_vm14 = vcmp.eq.s32.totalorder %v64_v39, %v662_v17 }
  0x41   :  { %476 = vmatpush1.msk.msra.mxu0 %vm80_vm15, %v627_v20  ;;  %556 = vmatpush1.msk.msra.mxu1 %vm80_vm15, %v627_v20  ;;  %vm128_vm15 = vcmp.eq.s32.totalorder %v64_v39, %v658_v13 }
  0x42   :  { %477 = vmatprep.subr.msk.mxu0 %vm143_vm0, %v627_v20  ;;  %525 = vmatprep.subr.msk.mxu1 %vm143_vm0, %v627_v20  ;;  %vm127_vm0 = vcmp.eq.s32.totalorder %v63_v40, %v662_v17 }
  0x43   :  { %478 = vmatpush2.msk.msra.mxu0 %vm142_vm1, %v627_v20  ;;  %557 = vmatpush2.msk.msra.mxu1 %vm142_vm1, %v627_v20  ;;  %vm126_vm1 = vcmp.eq.s32.totalorder %v63_v40, %v658_v13 }
  0x44   :  { %479 = vmatprep.subr.msk.mxu0 %vm141_vm2, %v627_v20  ;;  %526 = vmatprep.subr.msk.mxu1 %vm141_vm2, %v627_v20  ;;  %vm125_vm2 = vcmp.eq.s32.totalorder %v62_v41, %v662_v17 }
  0x45   :  { %480 = vmatpush2.msk.msra.mxu0 %vm140_vm3, %v627_v20  ;;  %558 = vmatpush2.msk.msra.mxu1 %vm140_vm3, %v627_v20  ;;  %vm124_vm3 = vcmp.eq.s32.totalorder %v62_v41, %v658_v13 }
  0x46   :  { %481 = vmatprep.subr.msk.mxu0 %vm139_vm4, %v627_v20  ;;  %527 = vmatprep.subr.msk.mxu1 %vm139_vm4, %v627_v20  ;;  %vm123_vm4 = vcmp.eq.s32.totalorder %v61_v42, %v662_v17 }
  0x47   :  { %482 = vmatpush2.msk.msra.mxu0 %vm138_vm5, %v627_v20  ;;  %559 = vmatpush2.msk.msra.mxu1 %vm138_vm5, %v627_v20  ;;  %vm122_vm5 = vcmp.eq.s32.totalorder %v61_v42, %v658_v13 }
  0x48   :  { %483 = vmatprep.subr.msk.mxu0 %vm137_vm6, %v627_v20  ;;  %528 = vmatprep.subr.msk.mxu1 %vm137_vm6, %v627_v20  ;;  %vm121_vm6 = vcmp.eq.s32.totalorder %v60_v43, %v662_v17 }
  0x49   :  { %484 = vmatpush2.msk.msra.mxu0 %vm136_vm7, %v627_v20  ;;  %560 = vmatpush2.msk.msra.mxu1 %vm136_vm7, %v627_v20  ;;  %vm120_vm7 = vcmp.eq.s32.totalorder %v60_v43, %v658_v13 }
  0x4a   :  { %485 = vmatprep.subr.msk.mxu0 %vm135_vm8, %v627_v20  ;;  %529 = vmatprep.subr.msk.mxu1 %vm135_vm8, %v627_v20  ;;  %vm119_vm8 = vcmp.eq.s32.totalorder %v59_v44, %v662_v17 }
  0x4b   :  { %486 = vmatpush2.msk.msra.mxu0 %vm134_vm9, %v627_v20  ;;  %561 = vmatpush2.msk.msra.mxu1 %vm134_vm9, %v627_v20  ;;  %vm118_vm9 = vcmp.eq.s32.totalorder %v59_v44, %v658_v13 }
  0x4c   :  { %487 = vmatprep.subr.msk.mxu0 %vm133_vm10, %v627_v20  ;;  %530 = vmatprep.subr.msk.mxu1 %vm133_vm10, %v627_v20  ;;  %vm117_vm10 = vcmp.eq.s32.totalorder %v58_v45, %v662_v17 }
  0x4d   :  { %488 = vmatpush2.msk.msra.mxu0 %vm132_vm11, %v627_v20  ;;  %562 = vmatpush2.msk.msra.mxu1 %vm132_vm11, %v627_v20  ;;  %vm116_vm11 = vcmp.eq.s32.totalorder %v58_v45, %v658_v13 }
  0x4e   :  { %489 = vmatprep.subr.msk.mxu0 %vm131_vm12, %v627_v20  ;;  %531 = vmatprep.subr.msk.mxu1 %vm131_vm12, %v627_v20  ;;  %vm115_vm12 = vcmp.eq.s32.totalorder %v57_v46, %v662_v17 }
  0x4f   :  { %490 = vmatpush2.msk.msra.mxu0 %vm130_vm13, %v627_v20  ;;  %563 = vmatpush2.msk.msra.mxu1 %vm130_vm13, %v627_v20  ;;  %vm114_vm13 = vcmp.eq.s32.totalorder %v57_v46, %v658_v13 }
  0x50   :  { %491 = vmatprep.subr.msk.mxu0 %vm129_vm14, %v627_v20  ;;  %532 = vmatprep.subr.msk.mxu1 %vm129_vm14, %v627_v20  ;;  %vm113_vm14 = vcmp.eq.s32.totalorder %v56_v47, %v662_v17 }
  0x51   :  { %492 = vmatpush2.msk.msra.mxu0 %vm128_vm15, %v627_v20  ;;  %564 = vmatpush2.msk.msra.mxu1 %vm128_vm15, %v627_v20  ;;  %vm112_vm15 = vcmp.eq.s32.totalorder %v56_v47, %v658_v13 }
  0x52   :  { %493 = vmatprep.subr.msk.mxu0 %vm127_vm0, %v627_v20  ;;  %533 = vmatprep.subr.msk.mxu1 %vm127_vm0, %v627_v20 }
  0x53   :  { %494 = vmatpush2.msk.msra.mxu0 %vm126_vm1, %v627_v20  ;;  %565 = vmatpush2.msk.msra.mxu1 %vm126_vm1, %v627_v20 }
  0x54   :  { %495 = vmatprep.subr.msk.mxu0 %vm125_vm2, %v627_v20  ;;  %534 = vmatprep.subr.msk.mxu1 %vm125_vm2, %v627_v20 }
  0x55   :  { %496 = vmatpush2.msk.msra.mxu0 %vm124_vm3, %v627_v20  ;;  %566 = vmatpush2.msk.msra.mxu1 %vm124_vm3, %v627_v20 }
  0x56   :  { %497 = vmatprep.subr.msk.mxu0 %vm123_vm4, %v627_v20  ;;  %535 = vmatprep.subr.msk.mxu1 %vm123_vm4, %v627_v20 }
  0x57   :  { %498 = vmatpush2.msk.msra.mxu0 %vm122_vm5, %v627_v20  ;;  %567 = vmatpush2.msk.msra.mxu1 %vm122_vm5, %v627_v20 }
  0x58   :  { %499 = vmatprep.subr.msk.mxu0 %vm121_vm6, %v627_v20  ;;  %536 = vmatprep.subr.msk.mxu1 %vm121_vm6, %v627_v20 }
  0x59   :  { %500 = vmatpush2.msk.msra.mxu0 %vm120_vm7, %v627_v20  ;;  %568 = vmatpush2.msk.msra.mxu1 %vm120_vm7, %v627_v20 }
  0x5a   :  { %501 = vmatprep.subr.msk.mxu0 %vm119_vm8, %v627_v20  ;;  %537 = vmatprep.subr.msk.mxu1 %vm119_vm8, %v627_v20 }
  0x5b   :  { %502 = vmatpush2.msk.msra.mxu0 %vm118_vm9, %v627_v20  ;;  %569 = vmatpush2.msk.msra.mxu1 %vm118_vm9, %v627_v20 }
  0x5c   :  { %503 = vmatprep.subr.msk.mxu0 %vm117_vm10, %v627_v20  ;;  %538 = vmatprep.subr.msk.mxu1 %vm117_vm10, %v627_v20 }
  0x5d   :  { %504 = vmatpush2.msk.msra.mxu0 %vm116_vm11, %v627_v20  ;;  %570 = vmatpush2.msk.msra.mxu1 %vm116_vm11, %v627_v20 }
  0x5e   :  { %505 = vmatprep.subr.msk.mxu0 %vm115_vm12, %v627_v20  ;;  %539 = vmatprep.subr.msk.mxu1 %vm115_vm12, %v627_v20 }
  0x5f   :  { %506 = vmatpush2.msk.msra.mxu0 %vm114_vm13, %v627_v20  ;;  %571 = vmatpush2.msk.msra.mxu1 %vm114_vm13, %v627_v20 }
  0x60   :  { %507 = vmatprep.subr.msk.mxu0 %vm113_vm14, %v627_v20  ;;  %540 = vmatprep.subr.msk.mxu1 %vm113_vm14, %v627_v20 }
  0x61   :  { %508 = vmatpush2.msk.msra.mxu0 %vm112_vm15, %v627_v20  ;;  %572 = vmatpush2.msk.msra.mxu1 %vm112_vm15, %v627_v20 }
  0x62   :  { %341 = vmatmul.mubr.f32.vlgmr.msra.gmra.mxu0 %v272_v48  ;;  %347 = vmatmul.mubr.f32.vlgmr.msra.gmra.mxu1 %v274_v49 }
 0x122   :  { %v342_v50 = vpop.f32.mrf.mxu0  ;;  %v348_v51 = vpop.f32.mrf.mxu1 }
 0x124   :  { %v344_v52 = vpop.f32.mrf.mxu0  ;;  %v350_v53 = vpop.f32.mrf.mxu1 }
 0x125   :  { %v353_v54 = vmul.f32 %v344_v52, %v342_v50  ;;  %v354_v55 = vmul.f32 %v350_v53, %v348_v51 }
 0x127   :  { %v355_v56 = vadd.f32 %v354_v55, %v353_v54 }
 0x129   :  { %v356_v57 = vrot.slane %v355_v56, 4 }
 0x12b   :  { %v357_v58 = vadd.f32 %v356_v57, %v355_v56 }
 0x12d   :  { %v358_v59 = vrot.slane %v357_v58, 2 }
 0x12f   :  { %v359_v60 = vadd.f32 %v358_v59, %v357_v58 }
 0x131   :  { %v360_v61 = vrot.slane %v359_v60, 1 }
 0x133   :  { %v361_v63 = vadd.f32 %v360_v61, %v359_v60 }
 0x135   :  { %v364_v0 = vadd.f32 %v363_v62, %v361_v63 }
 0x137   :  { %365 = vst [vmem:[#allocation6] sm:$0x1] %v364_v0 }
 0x138   :  { %611 = shalt.err (!%p608_p9)
}
 0x139   :  { %375 = dma.vmem_to_hbm [thread:$0]  %s373_s22, 16, %s896_s3, [#allocation5]  }
 0x13a   :  { %622 = dma.done.wait [#allocation5], 16  }
 0x13b   :  { %623 = vsyncadd [#allocation5], 4294967280 }
 0x13c   :  { %379 = vsyncpa [#allocation4], 1 }
 0x13d   :  { %380 = vsyncpa [#allocation5], 1 }

</bundles_post_ra>
